<compile_context>
chip_gen: v7x
topology: tpu7x:2x2x1
jax: 0.10.0
libtpu: 0.0.40
codegen_flags: <defaults>
</compile_context>

<pallas_src>
import functools
import math

import jax
import jax.numpy as jnp
from jax.experimental import pallas as pl
from jax.experimental.pallas import tpu as pltpu

_LANE = 1024                      # lane-dense width (multiple of 128 -> unmasked vst)
_SMALL_FALLBACK_ELEMS = 1 << 18   # below this, fused XLA elementwise beats pallas_call overhead


# ---------------------------------------------------------------------------
# Chip-gated tiling limits
# ---------------------------------------------------------------------------
@functools.lru_cache(maxsize=1)
def _chip_limits():
    """Returns (max_block_rows, vmem_limit_bytes), gated per TPU generation."""
    # Safe-everywhere default: 2 MiB blocks, 24 MiB of pipeline buffers,
    # 48 MiB scoped limit (fits v7x's 64 MiB per-TC VMEM with headroom).
    max_rows, vmem_limit = 512, 48 * 1024 * 1024
    try:
        info = pltpu.get_tpu_info()
        vmem = int(getattr(info, "vmem_capacity_bytes", 0))
        if vmem >= 128 * 1024 * 1024:
            # v5e / v6e: 128 MiB physical VMEM -> 4 MiB blocks are comfortable.
            max_rows, vmem_limit = 1024, 64 * 1024 * 1024
    except Exception:
        pass
    return max_rows, vmem_limit


def _pick_block_rows(rows, max_block_rows):
    """Pick the row-block size; prefer >=2 blocks so a 'parallel' grid axis can
    shard across both v7x TensorCores (extra grid step costs ~0.35us, noise)."""
    if rows > max_block_rows:
        return max_block_rows
    if rows >= 16:
        half = pl.cdiv(rows, 2)
        return max(8, ((half + 7) // 8) * 8)   # non-full blocks must be multiples of 8
    return rows                                 # single block == full array dim


# ---------------------------------------------------------------------------
# Shared elementwise update (exact PyTorch semantics)
# ---------------------------------------------------------------------------
def _recip_is_exact(v):
    # True iff v is a positive power of two (1/v exact in f32, so
    # floor(mem * (1/v)) == floor(mem / v) bit-exactly).
    if v <= 0.0:
        return False
    m, _ = math.frexp(v)
    return m == 0.5


def _floor_div_vth(mem, v_th):
    if v_th == 1.0:
        return jnp.floor(mem)
    if _recip_is_exact(v_th):
        return jnp.floor(mem * (1.0 / v_th))   # exact reciprocal -> cheap multiply
    return jnp.floor(mem / v_th)               # keep exact semantics otherwise


def _if_update(x, mem, tot, v_th):
    mem = mem + x                                   # membrane += x
    fired = mem >= v_th                             # spike mask
    spike = jnp.where(fired, _floor_div_vth(mem, v_th), 0.0)
    mem = mem - spike * v_th                        # soft reset
    tot = tot + spike                               # total_num += spike
    return spike, mem, tot


# ---------------------------------------------------------------------------
# Kernels
# ---------------------------------------------------------------------------
def _if_kernel(x_ref, mem_ref, tot_ref,
               spike_ref, mem_out_ref, tot_out_ref, *, v_th):
    """One elementwise tile of a single If-neuron step."""
    spike, mem, tot = _if_update(x_ref[...], mem_ref[...], tot_ref[...], v_th)
    spike_ref[...] = spike.astype(spike_ref.dtype)
    mem_out_ref[...] = mem
    tot_out_ref[...] = tot


def _if_multistep_kernel(x_ref, mem_ref, tot_ref,
                         spike_ref, mem_out_ref, tot_out_ref, *, v_th):
    """Fused T-timestep update; grid = (row_blocks, T), time axis last.

    mem_out_ref / tot_out_ref have a constant block index along the time axis,
    so they stay resident in VMEM and act as the state accumulators; they are
    DMA'd back to HBM only when the row-block changes.
    """
    @pl.when(pl.program_id(1) == 0)
    def _():
        mem_out_ref[...] = mem_ref[...]
        tot_out_ref[...] = tot_ref[...]

    spike, mem, tot = _if_update(x_ref[...], mem_out_ref[...], tot_out_ref[...], v_th)
    spike_ref[...] = spike.astype(spike_ref.dtype)
    mem_out_ref[...] = mem
    tot_out_ref[...] = tot


# ---------------------------------------------------------------------------
# Layout helpers (lane-dense slabs; zero-copy for 1024-aligned sizes)
# ---------------------------------------------------------------------------
def _to_lane_slab(a, rows, total):
    a = a.reshape(-1)
    if a.dtype != jnp.float32:
        a = a.astype(jnp.float32)
    pad = rows * _LANE - total
    if pad:                                  # only the <1024-element tail, if any
        a = jnp.pad(a, (0, pad))
    return a.reshape(rows, _LANE)


def _from_lane_slab(a, orig_shape, total):
    a = a.reshape(-1)
    if a.shape[0] != total:
        a = a[:total]
    return a.reshape(orig_shape)


# ---------------------------------------------------------------------------
# Single-step forward
# ---------------------------------------------------------------------------
def if_forward(x, membrane, total_num, v_th=1.0, *, force_pallas=False):
    """One forward step of the If neuron.

    Args:
      x, membrane, total_num: float arrays of identical shape.
    Returns:
      (spike, new_membrane, new_total_num), float32, same shape as x.
    """
    orig_shape = x.shape
    total = int(x.size)
    v_th = float(v_th)

    # Small-tensor fallback: a fused XLA elementwise chain beats kernel launch
    # + layout plumbing below the crossover.
    if total < _SMALL_FALLBACK_ELEMS and not force_pallas:
        return _if_update(x.astype(jnp.float32),
                          membrane.astype(jnp.float32),
                          total_num.astype(jnp.float32), v_th)

    rows = max(1, pl.cdiv(total, _LANE))
    max_block_rows, vmem_limit = _chip_limits()
    block_rows = _pick_block_rows(rows, max_block_rows)
    grid = (pl.cdiv(rows, block_rows),)

    x2 = _to_lane_slab(x, rows, total)
    m2 = _to_lane_slab(membrane, rows, total)
    t2 = _to_lane_slab(total_num, rows, total)

    spec = pl.BlockSpec((block_rows, _LANE), lambda i: (i, 0))
    out_sds = jax.ShapeDtypeStruct((rows, _LANE), jnp.float32)

    spike, mem_new, tot_new = pl.pallas_call(
        functools.partial(_if_kernel, v_th=v_th),
        grid=grid,
        in_specs=[spec, spec, spec],
        out_specs=[spec, spec, spec],
        out_shape=(out_sds, out_sds, out_sds),
        # In-place state update: membrane -> out 1, total_num -> out 2.
        input_output_aliases={1: 1, 2: 2},
        compiler_params=pltpu.CompilerParams(
            dimension_semantics=("parallel",),
            vmem_limit_bytes=vmem_limit,
        ),
        cost_estimate=pl.CostEstimate(
            flops=5 * rows * _LANE,
            transcendentals=0,
            bytes_accessed=24 * rows * _LANE,
        ),
    )(x2, m2, t2)

    return (_from_lane_slab(spike, orig_shape, total),
            _from_lane_slab(mem_new, orig_shape, total),
            _from_lane_slab(tot_new, orig_shape, total))


# ---------------------------------------------------------------------------
# Fused multi-timestep forward (state stays resident in VMEM)
# ---------------------------------------------------------------------------
def if_forward_multistep(xs, membrane, total_num, v_th=1.0, *, force_pallas=False):
    """Run T fused If-neuron steps.

    Args:
      xs:        float array of shape (T, *state_shape) — input current per step.
      membrane:  float array of shape state_shape.
      total_num: float array of shape state_shape.
    Returns:
      (spikes (T, *state_shape), new_membrane, new_total_num), float32.
    """
    T = int(xs.shape[0])
    state_shape = membrane.shape
    total = int(membrane.size)
    v_th = float(v_th)

    if total < _SMALL_FALLBACK_ELEMS and not force_pallas:
        def step(carry, x):
            mem, tot = carry
            spike, mem, tot = _if_update(x, mem, tot, v_th)
            return (mem, tot), spike
        (mem, tot), spikes = jax.lax.scan(
            step,
            (membrane.astype(jnp.float32), total_num.astype(jnp.float32)),
            xs.astype(jnp.float32))
        return spikes, mem, tot

    rows = max(1, pl.cdiv(total, _LANE))
    max_block_rows, vmem_limit = _chip_limits()
    block_rows = _pick_block_rows(rows, max_block_rows)
    n_row_blocks = pl.cdiv(rows, block_rows)

    pad = rows * _LANE - total
    xs2 = xs.reshape(T, -1).astype(jnp.float32)
    if pad:
        xs2 = jnp.pad(xs2, ((0, 0), (0, pad)))
    xs2 = xs2.reshape(T, rows, _LANE)
    m2 = _to_lane_slab(membrane, rows, total)
    t2 = _to_lane_slab(total_num, rows, total)

    # Time is the last (fastest-varying) grid axis, marked "arbitrary"; the
    # state blocks keep a constant index along it -> resident accumulators.
    x_spec = pl.BlockSpec((None, block_rows, _LANE), lambda i, t: (t, i, 0))
    spk_spec = pl.BlockSpec((None, block_rows, _LANE), lambda i, t: (t, i, 0))
    st_spec = pl.BlockSpec((block_rows, _LANE), lambda i, t: (i, 0))

    spikes, mem_new, tot_new = pl.pallas_call(
        functools.partial(_if_multistep_kernel, v_th=v_th),
        grid=(n_row_blocks, T),
        in_specs=[x_spec, st_spec, st_spec],
        out_specs=[spk_spec, st_spec, st_spec],
        out_shape=(
            jax.ShapeDtypeStruct((T, rows, _LANE), jnp.float32),
            jax.ShapeDtypeStruct((rows, _LANE), jnp.float32),
            jax.ShapeDtypeStruct((rows, _LANE), jnp.float32),
        ),
        input_output_aliases={1: 1, 2: 2},
        compiler_params=pltpu.CompilerParams(
            dimension_semantics=("parallel", "arbitrary"),
            vmem_limit_bytes=vmem_limit,
        ),
        cost_estimate=pl.CostEstimate(
            flops=5 * T * rows * _LANE,
            transcendentals=0,
            bytes_accessed=(8 * T + 16) * rows * _LANE,
        ),
    )(xs2, m2, t2)

    spikes = spikes.reshape(T, rows * _LANE)
    if pad:
        spikes = spikes[:, :total]
    spikes = spikes.reshape((T,) + tuple(state_shape))
    return (spikes,
            _from_lane_slab(mem_new, state_shape, total),
            _from_lane_slab(tot_new, state_shape, total))


# TODO(synk): the PyTorch module's class-level neuron counter (If.cnt) and the
# implicit create_neurons/reset mutation have no kernel equivalent; state is
# threaded functionally by the caller instead.


if __name__ == "__main__":
    key = jax.random.PRNGKey(0)
    N, C, H, W = 2, 4, 16, 16
    x = jax.random.uniform(key, (N, C, H, W), dtype=jnp.float32,
                           minval=0.0, maxval=2.0)

    # Fresh neuron state (create_neurons): zeros matching x's shape.
    membrane = jnp.zeros((N, C, H, W), jnp.float32)
    total_num = jnp.zeros((N, C, H, W), jnp.float32)

    # Plain-JAX reference semantics.
    def ref_step(x, mem, tot, v_th=1.0):
        mem = mem + x
        spike = jnp.where(mem >= v_th, jnp.floor(mem / v_th), 0.0)
        mem = mem - spike * v_th
        tot = tot + spike
        return spike, mem, tot

    # --- single-step Pallas kernel (forced: the demo tensor is below the
    # small-tensor XLA-fallback threshold) -----------------------------------
    spike1, membrane, total_num = if_forward(x, membrane, total_num, v_th=1.0,
                                             force_pallas=True)
    spike2, membrane, total_num = if_forward(x, membrane, total_num, v_th=1.0,
                                             force_pallas=True)
    jax.block_until_ready((spike1, spike2, membrane, total_num))

    rm = jnp.zeros_like(x)
    rt = jnp.zeros_like(x)
    rs1, rm, rt = ref_step(x, rm, rt)
    rs2, rm, rt = ref_step(x, rm, rt)
    assert jnp.allclose(spike1, rs1)
    assert jnp.allclose(spike2, rs2)
    assert jnp.allclose(membrane, rm)
    assert jnp.allclose(total_num, rt)

    # --- fused multi-timestep kernel ----------------------------------------
    T = 8
    xs = jax.random.uniform(jax.random.PRNGKey(1), (T, N, C, H, W),
                            dtype=jnp.float32, minval=0.0, maxval=2.0)
    mem0 = jnp.zeros((N, C, H, W), jnp.float32)
    tot0 = jnp.zeros((N, C, H, W), jnp.float32)
    spikes, mem_T, tot_T = if_forward_multistep(xs, mem0, tot0, v_th=1.0,
                                                force_pallas=True)
    jax.block_until_ready((spikes, mem_T, tot_T))

    rmem = jnp.zeros_like(mem0)
    rtot = jnp.zeros_like(tot0)
    ref_spikes = []
    for t in range(T):
        s, rmem, rtot = ref_step(xs[t], rmem, rtot)
        ref_spikes.append(s)
    ref_spikes = jnp.stack(ref_spikes)
    assert jnp.allclose(spikes, ref_spikes)
    assert jnp.allclose(mem_T, rmem)
    assert jnp.allclose(tot_T, rtot)

    # --- small-tensor XLA fallback vs. ragged (non-1024-aligned) Pallas path --
    xr = jax.random.uniform(jax.random.PRNGKey(2), (3, 5, 7), dtype=jnp.float32,
                            minval=0.0, maxval=2.0)
    mr = jnp.zeros_like(xr)
    tr = jnp.zeros_like(xr)
    s_fb, m_fb, t_fb = if_forward(xr, mr, tr, v_th=0.5)                     # jnp fallback
    s_pk, m_pk, t_pk = if_forward(xr, mr, tr, v_th=0.5, force_pallas=True)  # pallas, ragged tail
    jax.block_until_ready((s_fb, s_pk))
    assert jnp.allclose(s_fb, s_pk)
    assert jnp.allclose(m_fb, m_pk)
    assert jnp.allclose(t_fb, t_pk)

    print("KERNEL_OK")
</pallas_src>

<mosaic_0001>
module attributes {stable_mosaic.version = 11 : i64} {
  func.func @_if_kernel(%arg0: i32, %arg1: memref<2x1024xf32, #tpu.memory_space<vmem>>, %arg2: memref<2x1024xf32, #tpu.memory_space<vmem>>, %arg3: memref<2x1024xf32, #tpu.memory_space<vmem>>, %arg4: memref<2x1024xf32, #tpu.memory_space<vmem>>, %arg5: memref<2x1024xf32, #tpu.memory_space<vmem>>, %arg6: memref<2x1024xf32, #tpu.memory_space<vmem>>) attributes {dimension_semantics = [#tpu.dimension_semantics<parallel>], iteration_bounds = array<i64: 1>, scalar_prefetch = 0 : i64, scratch_operands = 0 : i64, tpu.core_type = #tpu.core_type<tc>, window_params = [{transform_indices = @transform_0, window_bounds = array<i64: 2, 1024>}, {transform_indices = @transform_1, window_bounds = array<i64: 2, 1024>}, {transform_indices = @transform_2, window_bounds = array<i64: 2, 1024>}, {transform_indices = @transform_3, window_bounds = array<i64: 2, 1024>}, {transform_indices = @transform_4, window_bounds = array<i64: 2, 1024>}, {transform_indices = @transform_5, window_bounds = array<i64: 2, 1024>}]} {
    %c0 = arith.constant 0 : index
    %c0_0 = arith.constant 0 : index
    %0 = vector.load %arg1[%c0, %c0_0] : memref<2x1024xf32, #tpu.memory_space<vmem>>, vector<2x1024xf32>
    %c0_1 = arith.constant 0 : index
    %c0_2 = arith.constant 0 : index
    %1 = vector.load %arg2[%c0_1, %c0_2] : memref<2x1024xf32, #tpu.memory_space<vmem>>, vector<2x1024xf32>
    %c0_3 = arith.constant 0 : index
    %c0_4 = arith.constant 0 : index
    %2 = vector.load %arg3[%c0_3, %c0_4] : memref<2x1024xf32, #tpu.memory_space<vmem>>, vector<2x1024xf32>
    %3 = arith.addf %1, %0 : vector<2x1024xf32>
    %cst = arith.constant 1.000000e+00 : f32
    %4 = vector.broadcast %cst : f32 to vector<2x1024xf32>
    %5 = arith.cmpf oge, %3, %4 : vector<2x1024xf32>
    %6 = math.floor %3 : vector<2x1024xf32>
    %cst_5 = arith.constant 0.000000e+00 : f32
    %7 = vector.broadcast %cst_5 : f32 to vector<2x1024xf32>
    %8 = arith.select %5, %6, %7 : vector<2x1024xi1>, vector<2x1024xf32>
    %cst_6 = arith.constant 1.000000e+00 : f32
    %9 = vector.broadcast %cst_6 : f32 to vector<2x1024xf32>
    %10 = arith.mulf %8, %9 : vector<2x1024xf32>
    %11 = arith.subf %3, %10 : vector<2x1024xf32>
    %12 = arith.addf %2, %8 : vector<2x1024xf32>
    %c0_7 = arith.constant 0 : index
    %c0_8 = arith.constant 0 : index
    %13 = vector.load %arg4[%c0_7, %c0_8] : memref<2x1024xf32, #tpu.memory_space<vmem>>, vector<2x1024xf32>
    tpu.vector_store %arg4[%c0_7, %c0_8], %8 {strides = array<i32>} : memref<2x1024xf32, #tpu.memory_space<vmem>>, vector<2x1024xf32>,
    %c0_9 = arith.constant 0 : index
    %c0_10 = arith.constant 0 : index
    %14 = vector.load %arg5[%c0_9, %c0_10] : memref<2x1024xf32, #tpu.memory_space<vmem>>, vector<2x1024xf32>
    tpu.vector_store %arg5[%c0_9, %c0_10], %11 {strides = array<i32>} : memref<2x1024xf32, #tpu.memory_space<vmem>>, vector<2x1024xf32>,
    %c0_11 = arith.constant 0 : index
    %c0_12 = arith.constant 0 : index
    %15 = vector.load %arg6[%c0_11, %c0_12] : memref<2x1024xf32, #tpu.memory_space<vmem>>, vector<2x1024xf32>
    tpu.vector_store %arg6[%c0_11, %c0_12], %12 {strides = array<i32>} : memref<2x1024xf32, #tpu.memory_space<vmem>>, vector<2x1024xf32>,
    return
  }
  func.func @transform_0(%arg0: i32) -> (i32, i32) {
    %c0_i32 = arith.constant 0 : i32
    %c0_i32_0 = arith.constant 0 : i32
    return %arg0, %c0_i32 : i32, i32
  }
  func.func @transform_1(%arg0: i32) -> (i32, i32) {
    %c0_i32 = arith.constant 0 : i32
    %c0_i32_0 = arith.constant 0 : i32
    return %arg0, %c0_i32 : i32, i32
  }
  func.func @transform_2(%arg0: i32) -> (i32, i32) {
    %c0_i32 = arith.constant 0 : i32
    %c0_i32_0 = arith.constant 0 : i32
    return %arg0, %c0_i32 : i32, i32
  }
  func.func @transform_3(%arg0: i32) -> (i32, i32) {
    %c0_i32 = arith.constant 0 : i32
    %c0_i32_0 = arith.constant 0 : i32
    return %arg0, %c0_i32 : i32, i32
  }
  func.func @transform_4(%arg0: i32) -> (i32, i32) {
    %c0_i32 = arith.constant 0 : i32
    %c0_i32_0 = arith.constant 0 : i32
    return %arg0, %c0_i32 : i32, i32
  }
  func.func @transform_5(%arg0: i32) -> (i32, i32) {
    %c0_i32 = arith.constant 0 : i32
    %c0_i32_0 = arith.constant 0 : i32
    return %arg0, %c0_i32 : i32, i32
  }
}

</mosaic_0001>

<bundles_post_ra>
// kernel: tpu_custom_call.1
= control target key start
LH: loop header
LB: loop body
LE: loop exit
PB: predicated region body
PF: predicated region fallthrough
CT: control target
= control target key end

     0   :  { %11 = vsyncpa [#allocation3], 0  ;;  %s348_s0 = inlined_call_operand.vmem [shape: f32[2,1024], index: 0, kind: input, shape index: {}]   ;;  %s349_s1 = inlined_call_operand.hbm [shape: f32[2,1024], index: 1, kind: input, shape index: {}, may-alias: {1,4}]   ;;  %s350_s2 = inlined_call_operand.hbm [shape: f32[2,1024], index: 2, kind: input, shape index: {}, may-alias: {2,5}]   ;;  %s351_s3 = inlined_call_operand.hbm [shape: f32[2,1024], index: 3, kind: output, shape index: {0}]   ;;  %s352_s4 = inlined_call_operand.hbm [shape: f32[2,1024], index: 4, kind: output, shape index: {1}, may-alias: {1,4}]   ;;  %s353_s5 = inlined_call_operand.hbm [shape: f32[2,1024], index: 5, kind: output, shape index: {2}, may-alias: {2,5}]  }
   0x1   :  { %12 = vsyncpa [#allocation6], 0 }
   0x2   :  { %13 = vsyncpa [#allocation4], 0 }
   0x3   :  { %14 = vsyncpa [#allocation9], 0  ;;  %s233_s18 = smov [#allocation2]   ;;  %s234_s20 = smov [#allocation5]  }
   0x4   :  { %s23_s19 = sshll.u32 %s233_s18, 4  ;;  %s33_s21 = sshll.u32 %s234_s20, 4  ;;  %s24_s19 = int_to_ptr.vmem [resolvable:$true] %s23_s19  ;;  %s34_s21 = int_to_ptr.vmem [resolvable:$true] %s33_s21 }
   0x5   :  { %s115_s24 = scalar_lea.hbm %s349_s1, 256 }
   0x6   :  { %p116_p0 = scmp.ne.s32.totalorder %s349_s1, %s115_s24  ;;  %p119_p1 = scmp.lt.u32.totalorder %s115_s24, %s349_s1 }
   0x8   :  { %p121_p2 = pnand %p119_p1, %p116_p0 }
   0xa   :  { %124 = shalt.err (!%p121_p2)
}
   0xb   :  { %s125_s29 = scalar_lea.vmem %s24_s19, 256  ;;  %p130_p4 = scmp.lt.s32.totalorder %s24_s19, %s24_s19 }
   0xc   :  { %p126_p3 = scmp.ne.s32.totalorder %s24_s19, %s125_s29  ;;  %p131_p5 = scmp.lt.s32.totalorder %s125_s29, %s125_s29 }
   0xe   :  { %p132_p6 = por %p131_p5, %p130_p4 }
  0x10   :  { %p133_p7 = pnand %p132_p6, %p126_p3 }
  0x12   :  { %136 = shalt.err (!%p133_p7)
}
  0x13   :  { %26 = dma.hbm_to_vmem [thread:$0]  %s349_s1, 256, %s24_s19, [#allocation3]  }
  0x14   :  { %s137_s9 = scalar_lea.hbm %s350_s2, 256 }
  0x15   :  { %p138_p8 = scmp.ne.s32.totalorder %s350_s2, %s137_s9  ;;  %p141_p9 = scmp.lt.u32.totalorder %s137_s9, %s350_s2 }
  0x17   :  { %p143_p10 = pnand %p141_p9, %p138_p8 }
  0x19   :  { %146 = shalt.err (!%p143_p10)
}
  0x1a   :  { %s147_s14 = scalar_lea.vmem %s34_s21, 256  ;;  %p152_p12 = scmp.lt.s32.totalorder %s34_s21, %s34_s21 }
  0x1b   :  { %p148_p11 = scmp.ne.s32.totalorder %s34_s21, %s147_s14  ;;  %p153_p13 = scmp.lt.s32.totalorder %s147_s14, %s147_s14 }
  0x1d   :  { %p154_p0 = por %p153_p13, %p152_p12 }
  0x1f   :  { %p155_p1 = pnand %p154_p0, %p148_p11 }
  0x21   :  { %158 = shalt.err (!%p155_p1)
}
  0x22   :  { %36 = dma.hbm_to_vmem [thread:$0]  %s350_s2, 256, %s34_s21, [#allocation6]  }
  0x23   :  { %225 = dma.done.wait [#allocation3], 256  }
  0x24   :  { %226 = vsyncadd [#allocation3], 4294967040 }
  0x25   :  { %227 = dma.done.wait [#allocation6], 256  }
  0x26   :  { %228 = vsyncadd [#allocation6], 4294967040  ;;  %v43_v0 = vld [vmem:[%s348_s0] sm:$0xff]  ;;  %v44_v2 = vld [vmem:[%s348_s0 + $0x8] sm:$0xff]  ;;  %s235_s20 = smov [#allocation7]   ;;  %s236_s2 = smov [#allocation8]  }
  0x27   :  { %v45_v1 = vld [vmem:[#allocation2] sm:$0xff]  ;;  %v46_v4 = vld [vmem:[#allocation2 + $0x8] sm:$0xff]  ;;  %s73_s22 = sshll.u32 %s235_s20, 4  ;;  %v47_v7 = vld [vmem:[#allocation5] sm:$0xff]  ;;  %s83_s21 = sshll.u32 %s236_s2, 4  ;;  %s74_s22 = int_to_ptr.vmem [resolvable:$true] %s73_s22  ;;  %s298_s21 = int_to_ptr.vmem [resolvable:$true] %s83_s21 }
  0x28   :  { %v49_v3 = vadd.f32 %v45_v1, %v43_v0  ;;  %v50_v5 = vadd.f32 %v46_v4, %v44_v2  ;;  %v48_v9 = vld [vmem:[#allocation5 + $0x8] sm:$0xff]  ;;  %s237_s23 = smov [#allocation10]   ;;  %s159_s0 = scalar_lea.vmem %s74_s22, 256 }
  0x29   :  { %s93_s24 = sshll.u32 %s237_s23, 4  ;;  %p160_p2 = scmp.ne.s32.totalorder %s74_s22, %s159_s0  ;;  %s300_s24 = int_to_ptr.vmem [resolvable:$true] %s93_s24 }
  0x2a   :  { %vm51_vm0 = vcmp.ge.f32.partialorder %v49_v3, 1.0  ;;  %v53_v6 = vfloor.f32 %v49_v3  ;;  %vm52_vm1 = vcmp.ge.f32.partialorder %v50_v5, 1.0  ;;  %v54_v8 = vfloor.f32 %v50_v5  ;;  %p164_p3 = scmp.lt.s32.totalorder %s74_s22, %s74_s22  ;;  %p165_p4 = scmp.lt.s32.totalorder %s159_s0, %s159_s0 }
  0x2c   :  { %v55_v10 = vsel %vm51_vm0, %v53_v6, 0.0  ;;  %v56_v12 = vsel %vm52_vm1, %v54_v8, 0.0  ;;  %p166_p5 = por %p165_p4, %p164_p3 }
  0x2d   :  { %v57_v11 = vsub.f32 %v49_v3, %v55_v10  ;;  %61 = vst [vmem:[#allocation7] sm:$0xff] %v55_v10  ;;  %v59_v13 = vadd.f32 %v55_v10, %v47_v7  ;;  %v58_v14 = vsub.f32 %v50_v5, %v56_v12  ;;  %62 = vst [vmem:[#allocation7 + $0x8] sm:$0xff] %v56_v12 }
  0x2e   :  { %v60_v15 = vadd.f32 %v56_v12, %v48_v9  ;;  %p167_p6 = pnand %p166_p5, %p160_p2 }
  0x2f   :  { %63 = vst [vmem:[#allocation8] sm:$0xff] %v57_v11  ;;  %65 = vst [vmem:[#allocation10] sm:$0xff] %v59_v13 }
  0x30   :  { %170 = shalt.err (!%p167_p6)
}
  0x31   :  { %s171_s27 = scalar_lea.hbm %s351_s3, 256 }
  0x32   :  { %p172_p7 = scmp.ne.s32.totalorder %s351_s3, %s171_s27  ;;  %p175_p8 = scmp.lt.u32.totalorder %s171_s27, %s351_s3 }
  0x34   :  { %p177_p9 = pnand %p175_p8, %p172_p7 }
  0x36   :  { %180 = shalt.err (!%p177_p9)
}
  0x37   :  { %76 = dma.vmem_to_hbm [thread:$0]  %s74_s22, 256, %s351_s3, [#allocation4]   ;;  %64 = vst [vmem:[#allocation8 + $0x8] sm:$0xff] %v58_v14  ;;  %66 = vst [vmem:[#allocation10 + $0x8] sm:$0xff] %v60_v15 }
  0x38   :  { %s181_s9 = scalar_lea.vmem %s298_s21, 256  ;;  %p186_p11 = scmp.lt.s32.totalorder %s298_s21, %s298_s21 }
  0x39   :  { %p182_p10 = scmp.ne.s32.totalorder %s298_s21, %s181_s9  ;;  %p187_p12 = scmp.lt.s32.totalorder %s181_s9, %s181_s9 }
  0x3b   :  { %p188_p13 = por %p187_p12, %p186_p11 }
  0x3d   :  { %p189_p0 = pnand %p188_p13, %p182_p10 }
  0x3f   :  { %192 = shalt.err (!%p189_p0)
}
  0x40   :  { %s193_s12 = scalar_lea.hbm %s352_s4, 256 }
  0x41   :  { %p194_p1 = scmp.ne.s32.totalorder %s352_s4, %s193_s12  ;;  %p197_p2 = scmp.lt.u32.totalorder %s193_s12, %s352_s4 }
  0x43   :  { %p199_p3 = pnand %p197_p2, %p194_p1 }
  0x45   :  { %202 = shalt.err (!%p199_p3)
}
  0x46   :  { %86 = dma.vmem_to_hbm [thread:$0]  %s298_s21, 256, %s352_s4, [#allocation9]  }
  0x47   :  { %s203_s17 = scalar_lea.vmem %s300_s24, 256  ;;  %p208_p5 = scmp.lt.s32.totalorder %s300_s24, %s300_s24 }
  0x48   :  { %p204_p4 = scmp.ne.s32.totalorder %s300_s24, %s203_s17  ;;  %p209_p6 = scmp.lt.s32.totalorder %s203_s17, %s203_s17 }
  0x4a   :  { %p210_p7 = por %p209_p6, %p208_p5 }
  0x4c   :  { %p211_p8 = pnand %p210_p7, %p204_p4 }
  0x4e   :  { %214 = shalt.err (!%p211_p8)
}
  0x4f   :  { %s215_s20 = scalar_lea.hbm %s353_s5, 256 }
  0x50   :  { %p216_p9 = scmp.ne.s32.totalorder %s353_s5, %s215_s20  ;;  %p219_p10 = scmp.lt.u32.totalorder %s215_s20, %s353_s5 }
  0x52   :  { %p221_p11 = pnand %p219_p10, %p216_p9 }
  0x54   :  { %224 = shalt.err (!%p221_p11)
}
  0x55   :  { %96 = dma.vmem_to_hbm [thread:$0]  %s300_s24, 256, %s353_s5, [#allocation9]  }
  0x56   :  { %229 = dma.done.wait [#allocation4], 256  }
  0x57   :  { %230 = vsyncadd [#allocation4], 4294967040 }
  0x58   :  { %231 = dma.done.wait [#allocation9], 512  }
  0x59   :  { %232 = vsyncadd [#allocation9], 4294966784 }
  0x5a   :  { %106 = vsyncpa [#allocation3], 1 }
  0x5b   :  { %107 = vsyncpa [#allocation6], 1 }
  0x5c   :  { %108 = vsyncpa [#allocation4], 1 }
  0x5d   :  { %109 = vsyncpa [#allocation9], 1 }

</bundles_post_ra>
